<compile_context>
chip_gen: v7x
topology: tpu7x:2x2x1
jax: 0.10.0
libtpu: 0.0.40
codegen_flags: <defaults>
</compile_context>

<pallas_src>
import functools

import jax
import jax.numpy as jnp
from jax.experimental import pallas as pl
from jax.experimental.pallas import tpu as pltpu

EPS = 1e-8


def _round_up(x, m):
    return ((x + m - 1) // m) * m


def painn_mixing_kernel(q_ref, mu_ref, wv_ref, ww_ref, w1q_ref, w1v_ref, b1_ref,
                        w2a_ref, w2b_ref, w2c_ref, b2a_ref, b2b_ref, b2c_ref,
                        qo_ref, muo_ref, *, fp):
    F = fp
    q = q_ref[...]                                    # (tn, F)
    mu = mu_ref[...]                                  # (tn, 3F)  lane-dense
    # Per spatial component slices are 128-aligned (F is a multiple of 128): free.
    mu_cs = [mu[:, c * F:(c + 1) * F] for c in range(3)]

    # mu_channel_mix without bias, split into W_V / W_W so no output slicing needed.
    wv = wv_ref[...]                                  # (F, F)
    ww = ww_ref[...]                                  # (F, F)
    Vs = [jnp.dot(m, wv, preferred_element_type=jnp.float32) for m in mu_cs]
    Ws = [jnp.dot(m, ww, preferred_element_type=jnp.float32) for m in mu_cs]

    # ||mu_V|| over the spatial axis with epsilon for stability.
    mu_Vn = jnp.sqrt(Vs[0] * Vs[0] + Vs[1] * Vs[1] + Vs[2] * Vs[2] + EPS)

    # intraatomic_context_net layer 1: [q, mu_Vn] @ W1 + b1, SiLU.  W1 is row-split.
    h = (jnp.dot(q, w1q_ref[...], preferred_element_type=jnp.float32)
         + jnp.dot(mu_Vn, w1v_ref[...], preferred_element_type=jnp.float32)
         + b1_ref[...])
    h = h * jax.nn.sigmoid(h)                         # SiLU

    # intraatomic_context_net layer 2 (no activation), W2 pre-split into 3 blocks.
    dq = jnp.dot(h, w2a_ref[...], preferred_element_type=jnp.float32) + b2a_ref[...]
    dmu = jnp.dot(h, w2b_ref[...], preferred_element_type=jnp.float32) + b2b_ref[...]
    dqmu = jnp.dot(h, w2c_ref[...], preferred_element_type=jnp.float32) + b2c_ref[...]

    # sum(mu_V * mu_W) over the spatial axis.
    vw = Vs[0] * Ws[0] + Vs[1] * Ws[1] + Vs[2] * Ws[2]

    qo_ref[...] = (q + dq + dqmu * vw).astype(qo_ref.dtype)
    muo_ref[...] = jnp.concatenate(
        [mu_cs[c] + dmu * Ws[c] for c in range(3)], axis=-1).astype(muo_ref.dtype)


def painn_mixing(q, mu, params, *, tile_n=1024):
    """q: (N, 1, F), mu: (N, 3, F), float32."""
    N, one, F = q.shape
    assert one == 1 and mu.shape == (N, 3, F)
    wmix, w1, b1, w2, b2 = params

    Fp = _round_up(F, 128)                           # lane-aligned feature dim
    tn = _round_up(max(8, min(tile_n, _round_up(N, 8))), 8)
    Np = _round_up(N, tn)                            # padded atom count

    def pad_to(a, axis, new):
        pad = [(0, 0)] * a.ndim
        pad[axis] = (0, new - a.shape[axis])
        return jnp.pad(a, pad)

    # Activations: pad F -> Fp, N -> Np; present mu lane-dense as (Np, 3*Fp).
    q_p = pad_to(pad_to(q.reshape(N, F), 1, Fp), 0, Np)
    mu_p = pad_to(pad_to(mu, 2, Fp), 0, Np).reshape(Np, 3 * Fp)

    # Weights: split at logical F boundaries first, then zero-pad to (Fp, Fp).
    wv = pad_to(pad_to(wmix[:, :F], 0, Fp), 1, Fp)
    ww = pad_to(pad_to(wmix[:, F:], 0, Fp), 1, Fp)
    w1q = pad_to(pad_to(w1[:F, :], 0, Fp), 1, Fp)
    w1v = pad_to(pad_to(w1[F:, :], 0, Fp), 1, Fp)
    b1p = pad_to(b1, 1, Fp)
    w2a = pad_to(pad_to(w2[:, 0 * F:1 * F], 0, Fp), 1, Fp)
    w2b = pad_to(pad_to(w2[:, 1 * F:2 * F], 0, Fp), 1, Fp)
    w2c = pad_to(pad_to(w2[:, 2 * F:3 * F], 0, Fp), 1, Fp)
    b2a = pad_to(b2[:, 0 * F:1 * F], 1, Fp)
    b2b = pad_to(b2[:, 1 * F:2 * F], 1, Fp)
    b2c = pad_to(b2[:, 2 * F:3 * F], 1, Fp)

    kern = functools.partial(painn_mixing_kernel, fp=Fp)
    const = lambda i: (0, 0)

    q_out, mu_out = pl.pallas_call(
        kern,
        out_shape=(jax.ShapeDtypeStruct((Np, Fp), q.dtype),
                   jax.ShapeDtypeStruct((Np, 3 * Fp), mu.dtype)),
        grid_spec=pltpu.PrefetchScalarGridSpec(
            num_scalar_prefetch=0,
            grid=(Np // tn,),
            in_specs=[
                pl.BlockSpec((tn, Fp), lambda i: (i, 0)),        # q
                pl.BlockSpec((tn, 3 * Fp), lambda i: (i, 0)),    # mu (lane-dense)
                pl.BlockSpec((Fp, Fp), const),                   # W_V
                pl.BlockSpec((Fp, Fp), const),                   # W_W
                pl.BlockSpec((Fp, Fp), const),                   # W1 (q rows)
                pl.BlockSpec((Fp, Fp), const),                   # W1 (||mu_V|| rows)
                pl.BlockSpec((1, Fp), const),                    # b1
                pl.BlockSpec((Fp, Fp), const),                   # W2 -> dq
                pl.BlockSpec((Fp, Fp), const),                   # W2 -> dmu
                pl.BlockSpec((Fp, Fp), const),                   # W2 -> dqmu
                pl.BlockSpec((1, Fp), const),                    # b2 -> dq
                pl.BlockSpec((1, Fp), const),                    # b2 -> dmu
                pl.BlockSpec((1, Fp), const),                    # b2 -> dqmu
            ],
            out_specs=[
                pl.BlockSpec((tn, Fp), lambda i: (i, 0)),
                pl.BlockSpec((tn, 3 * Fp), lambda i: (i, 0)),
            ],
        ),
        compiler_params=pltpu.CompilerParams(
            dimension_semantics=("parallel",)),
    )(q_p, mu_p, wv, ww, w1q, w1v, b1p, w2a, w2b, w2c, b2a, b2b, b2c)

    q_out = q_out[:N, :F].reshape(N, 1, F)
    mu_out = mu_out[:N].reshape(N, 3, Fp)[:, :, :F]
    return q_out, mu_out


def painn_mixing_ref(q, mu, params):
    """Pure-JAX reference mirroring the PyTorch forward exactly."""
    wmix, w1, b1, w2, b2 = params
    F = q.shape[-1]
    mu_mix = mu @ wmix                                           # (N, 3, 2F)
    mu_V, mu_W = mu_mix[..., :F], mu_mix[..., F:]
    mu_Vn = jnp.sqrt(jnp.sum(mu_V ** 2, axis=-2, keepdims=True) + EPS)
    ctx = jnp.concatenate([q, mu_Vn], axis=-1)                   # (N, 1, 2F)
    h = jax.nn.silu(ctx @ w1 + b1[0])
    x = h @ w2 + b2[0]                                           # (N, 1, 3F)
    dq, dmu, dqmu = x[..., :F], x[..., F:2 * F], x[..., 2 * F:]
    dmu = dmu * mu_W
    dqmu = dqmu * jnp.sum(mu_V * mu_W, axis=1, keepdims=True)
    return q + dq + dqmu, mu + dmu


def init_params(key, n_atom_basis):
    F = n_atom_basis
    ks = jax.random.split(key, 5)
    s = 1.0 / jnp.sqrt(F)
    wmix = jax.random.normal(ks[0], (F, 2 * F), jnp.float32) * s   # no bias
    w1 = jax.random.normal(ks[1], (2 * F, F), jnp.float32) * s
    b1 = jax.random.normal(ks[2], (1, F), jnp.float32) * 0.1
    w2 = jax.random.normal(ks[3], (F, 3 * F), jnp.float32) * s
    b2 = jax.random.normal(ks[4], (1, 3 * F), jnp.float32) * 0.1
    return (wmix, w1, b1, w2, b2)


if __name__ == "__main__":
    key = jax.random.PRNGKey(0)
    k_q, k_mu, k_p = jax.random.split(key, 3)

    # Small demo shapes (exercise the F-padding path: F=32 -> Fp=128).
    n_atoms = 8
    n_atom_basis = 32

    q = jax.random.normal(k_q, (n_atoms, 1, n_atom_basis), jnp.float32)
    mu = jax.random.normal(k_mu, (n_atoms, 3, n_atom_basis), jnp.float32)
    params = init_params(k_p, n_atom_basis)

    q_out, mu_out = painn_mixing(q, mu, params)
    jax.block_until_ready((q_out, mu_out))

    q_exp, mu_exp = painn_mixing_ref(q, mu, params)
    assert q_out.shape == (n_atoms, 1, n_atom_basis)
    assert mu_out.shape == (n_atoms, 3, n_atom_basis)
    assert jnp.allclose(q_out, q_exp, atol=1e-5, rtol=1e-5), "q mismatch"
    assert jnp.allclose(mu_out, mu_exp, atol=1e-5, rtol=1e-5), "mu mismatch"

    # Second check: N not divisible by the tile and a multi-step grid.
    n2 = 20
    q2 = jax.random.normal(k_q, (n2, 1, n_atom_basis), jnp.float32)
    mu2 = jax.random.normal(k_mu, (n2, 3, n_atom_basis), jnp.float32)
    q2_out, mu2_out = painn_mixing(q2, mu2, params, tile_n=8)
    jax.block_until_ready((q2_out, mu2_out))
    q2_exp, mu2_exp = painn_mixing_ref(q2, mu2, params)
    assert jnp.allclose(q2_out, q2_exp, atol=1e-5, rtol=1e-5), "q mismatch (tiled)"
    assert jnp.allclose(mu2_out, mu2_exp, atol=1e-5, rtol=1e-5), "mu mismatch (tiled)"

    print("KERNEL_OK")
</pallas_src>

<mosaic_0001>
module attributes {stable_mosaic.version = 11 : i64} {
  func.func @painn_mixing_kernel(%arg0: i32, %arg1: memref<8x128xf32, #tpu.memory_space<vmem>>, %arg2: memref<8x384xf32, #tpu.memory_space<vmem>>, %arg3: memref<128x128xf32, #tpu.memory_space<vmem>>, %arg4: memref<128x128xf32, #tpu.memory_space<vmem>>, %arg5: memref<128x128xf32, #tpu.memory_space<vmem>>, %arg6: memref<128x128xf32, #tpu.memory_space<vmem>>, %arg7: memref<1x128xf32, #tpu.memory_space<vmem>>, %arg8: memref<128x128xf32, #tpu.memory_space<vmem>>, %arg9: memref<128x128xf32, #tpu.memory_space<vmem>>, %arg10: memref<128x128xf32, #tpu.memory_space<vmem>>, %arg11: memref<1x128xf32, #tpu.memory_space<vmem>>, %arg12: memref<1x128xf32, #tpu.memory_space<vmem>>, %arg13: memref<1x128xf32, #tpu.memory_space<vmem>>, %arg14: memref<8x128xf32, #tpu.memory_space<vmem>>, %arg15: memref<8x384xf32, #tpu.memory_space<vmem>>) attributes {dimension_semantics = [#tpu.dimension_semantics<parallel>], iteration_bounds = array<i64: 1>, scalar_prefetch = 0 : i64, scratch_operands = 0 : i64, tpu.core_type = #tpu.core_type<tc>, window_params = [{transform_indices = @transform_0, window_bounds = array<i64: 8, 128>}, {transform_indices = @transform_1, window_bounds = array<i64: 8, 384>}, {pipeline_mode = #tpu.pipeline_mode<synchronous>, transform_indices = @transform_2, window_bounds = array<i64: 128, 128>}, {pipeline_mode = #tpu.pipeline_mode<synchronous>, transform_indices = @transform_3, window_bounds = array<i64: 128, 128>}, {pipeline_mode = #tpu.pipeline_mode<synchronous>, transform_indices = @transform_4, window_bounds = array<i64: 128, 128>}, {pipeline_mode = #tpu.pipeline_mode<synchronous>, transform_indices = @transform_5, window_bounds = array<i64: 128, 128>}, {pipeline_mode = #tpu.pipeline_mode<synchronous>, transform_indices = @transform_6, window_bounds = array<i64: 1, 128>}, {pipeline_mode = #tpu.pipeline_mode<synchronous>, transform_indices = @transform_7, window_bounds = array<i64: 128, 128>}, {pipeline_mode = #tpu.pipeline_mode<synchronous>, transform_indices = @transform_8, window_bounds = array<i64: 128, 128>}, {pipeline_mode = #tpu.pipeline_mode<synchronous>, transform_indices = @transform_9, window_bounds = array<i64: 128, 128>}, {pipeline_mode = #tpu.pipeline_mode<synchronous>, transform_indices = @transform_10, window_bounds = array<i64: 1, 128>}, {pipeline_mode = #tpu.pipeline_mode<synchronous>, transform_indices = @transform_11, window_bounds = array<i64: 1, 128>}, {pipeline_mode = #tpu.pipeline_mode<synchronous>, transform_indices = @transform_12, window_bounds = array<i64: 1, 128>}, {transform_indices = @transform_13, window_bounds = array<i64: 8, 128>}, {transform_indices = @transform_14, window_bounds = array<i64: 8, 384>}]} {
    %c0 = arith.constant 0 : index
    %c0_0 = arith.constant 0 : index
    %0 = vector.load %arg1[%c0, %c0_0] : memref<8x128xf32, #tpu.memory_space<vmem>>, vector<8x128xf32>
    %c0_1 = arith.constant 0 : index
    %c0_2 = arith.constant 0 : index
    %1 = vector.load %arg2[%c0_1, %c0_2] : memref<8x384xf32, #tpu.memory_space<vmem>>, vector<8x384xf32>
    %2 = vector.extract_strided_slice %1 {offsets = [0, 0], sizes = [8, 128], strides = [1, 1]} : vector<8x384xf32> to vector<8x128xf32>
    %3 = vector.extract_strided_slice %1 {offsets = [0, 128], sizes = [8, 128], strides = [1, 1]} : vector<8x384xf32> to vector<8x128xf32>
    %4 = vector.extract_strided_slice %1 {offsets = [0, 256], sizes = [8, 128], strides = [1, 1]} : vector<8x384xf32> to vector<8x128xf32>
    %c0_3 = arith.constant 0 : index
    %c0_4 = arith.constant 0 : index
    %5 = vector.load %arg3[%c0_3, %c0_4] : memref<128x128xf32, #tpu.memory_space<vmem>>, vector<128x128xf32>
    %c0_5 = arith.constant 0 : index
    %c0_6 = arith.constant 0 : index
    %6 = vector.load %arg4[%c0_5, %c0_6] : memref<128x128xf32, #tpu.memory_space<vmem>>, vector<128x128xf32>
    %cst = arith.constant dense<0.000000e+00> : vector<8x128xf32>
    %7 = tpu.matmul %2, %5, %cst {dimension_numbers = #tpu.dot_dimension_numbers<[1], [0], [0], [1], [0, 0, 1, 1], [], []>} : vector<8x128xf32>, vector<128x128xf32>, vector<8x128xf32> -> vector<8x128xf32>
    %cst_7 = arith.constant dense<0.000000e+00> : vector<8x128xf32>
    %8 = tpu.matmul %3, %5, %cst_7 {dimension_numbers = #tpu.dot_dimension_numbers<[1], [0], [0], [1], [0, 0, 1, 1], [], []>} : vector<8x128xf32>, vector<128x128xf32>, vector<8x128xf32> -> vector<8x128xf32>
    %cst_8 = arith.constant dense<0.000000e+00> : vector<8x128xf32>
    %9 = tpu.matmul %4, %5, %cst_8 {dimension_numbers = #tpu.dot_dimension_numbers<[1], [0], [0], [1], [0, 0, 1, 1], [], []>} : vector<8x128xf32>, vector<128x128xf32>, vector<8x128xf32> -> vector<8x128xf32>
    %cst_9 = arith.constant dense<0.000000e+00> : vector<8x128xf32>
    %10 = tpu.matmul %2, %6, %cst_9 {dimension_numbers = #tpu.dot_dimension_numbers<[1], [0], [0], [1], [0, 0, 1, 1], [], []>} : vector<8x128xf32>, vector<128x128xf32>, vector<8x128xf32> -> vector<8x128xf32>
    %cst_10 = arith.constant dense<0.000000e+00> : vector<8x128xf32>
    %11 = tpu.matmul %3, %6, %cst_10 {dimension_numbers = #tpu.dot_dimension_numbers<[1], [0], [0], [1], [0, 0, 1, 1], [], []>} : vector<8x128xf32>, vector<128x128xf32>, vector<8x128xf32> -> vector<8x128xf32>
    %cst_11 = arith.constant dense<0.000000e+00> : vector<8x128xf32>
    %12 = tpu.matmul %4, %6, %cst_11 {dimension_numbers = #tpu.dot_dimension_numbers<[1], [0], [0], [1], [0, 0, 1, 1], [], []>} : vector<8x128xf32>, vector<128x128xf32>, vector<8x128xf32> -> vector<8x128xf32>
    %13 = arith.mulf %7, %7 : vector<8x128xf32>
    %14 = arith.mulf %8, %8 : vector<8x128xf32>
    %15 = arith.addf %13, %14 : vector<8x128xf32>
    %16 = arith.mulf %9, %9 : vector<8x128xf32>
    %17 = arith.addf %15, %16 : vector<8x128xf32>
    %cst_12 = arith.constant 9.99999993E-9 : f32
    %18 = vector.broadcast %cst_12 : f32 to vector<8x128xf32>
    %19 = arith.addf %17, %18 : vector<8x128xf32>
    %20 = math.sqrt %19 : vector<8x128xf32>
    %c0_13 = arith.constant 0 : index
    %c0_14 = arith.constant 0 : index
    %21 = vector.load %arg5[%c0_13, %c0_14] : memref<128x128xf32, #tpu.memory_space<vmem>>, vector<128x128xf32>
    %cst_15 = arith.constant dense<0.000000e+00> : vector<8x128xf32>
    %22 = tpu.matmul %0, %21, %cst_15 {dimension_numbers = #tpu.dot_dimension_numbers<[1], [0], [0], [1], [0, 0, 1, 1], [], []>} : vector<8x128xf32>, vector<128x128xf32>, vector<8x128xf32> -> vector<8x128xf32>
    %c0_16 = arith.constant 0 : index
    %c0_17 = arith.constant 0 : index
    %23 = vector.load %arg6[%c0_16, %c0_17] : memref<128x128xf32, #tpu.memory_space<vmem>>, vector<128x128xf32>
    %cst_18 = arith.constant dense<0.000000e+00> : vector<8x128xf32>
    %24 = tpu.matmul %20, %23, %cst_18 {dimension_numbers = #tpu.dot_dimension_numbers<[1], [0], [0], [1], [0, 0, 1, 1], [], []>} : vector<8x128xf32>, vector<128x128xf32>, vector<8x128xf32> -> vector<8x128xf32>
    %25 = arith.addf %22, %24 : vector<8x128xf32>
    %c0_19 = arith.constant 0 : index
    %c0_20 = arith.constant 0 : index
    %26 = vector.load %arg7[%c0_19, %c0_20] : memref<1x128xf32, #tpu.memory_space<vmem>>, vector<1x128xf32>
    %27 = vector.broadcast %26 : vector<1x128xf32> to vector<8x128xf32>
    %28 = arith.addf %25, %27 : vector<8x128xf32>
    %29 = arith.negf %28 : vector<8x128xf32>
    %30 = math.exp %29 : vector<8x128xf32>
    %cst_21 = arith.constant 1.000000e+00 : f32
    %31 = vector.broadcast %cst_21 : f32 to vector<8x128xf32>
    %32 = arith.addf %31, %30 : vector<8x128xf32>
    %33 = arith.divf %31, %32 : vector<8x128xf32>
    %34 = arith.mulf %28, %33 : vector<8x128xf32>
    %c0_22 = arith.constant 0 : index
    %c0_23 = arith.constant 0 : index
    %35 = vector.load %arg8[%c0_22, %c0_23] : memref<128x128xf32, #tpu.memory_space<vmem>>, vector<128x128xf32>
    %cst_24 = arith.constant dense<0.000000e+00> : vector<8x128xf32>
    %36 = tpu.matmul %34, %35, %cst_24 {dimension_numbers = #tpu.dot_dimension_numbers<[1], [0], [0], [1], [0, 0, 1, 1], [], []>} : vector<8x128xf32>, vector<128x128xf32>, vector<8x128xf32> -> vector<8x128xf32>
    %c0_25 = arith.constant 0 : index
    %c0_26 = arith.constant 0 : index
    %37 = vector.load %arg11[%c0_25, %c0_26] : memref<1x128xf32, #tpu.memory_space<vmem>>, vector<1x128xf32>
    %38 = vector.broadcast %37 : vector<1x128xf32> to vector<8x128xf32>
    %39 = arith.addf %36, %38 : vector<8x128xf32>
    %c0_27 = arith.constant 0 : index
    %c0_28 = arith.constant 0 : index
    %40 = vector.load %arg9[%c0_27, %c0_28] : memref<128x128xf32, #tpu.memory_space<vmem>>, vector<128x128xf32>
    %cst_29 = arith.constant dense<0.000000e+00> : vector<8x128xf32>
    %41 = tpu.matmul %34, %40, %cst_29 {dimension_numbers = #tpu.dot_dimension_numbers<[1], [0], [0], [1], [0, 0, 1, 1], [], []>} : vector<8x128xf32>, vector<128x128xf32>, vector<8x128xf32> -> vector<8x128xf32>
    %c0_30 = arith.constant 0 : index
    %c0_31 = arith.constant 0 : index
    %42 = vector.load %arg12[%c0_30, %c0_31] : memref<1x128xf32, #tpu.memory_space<vmem>>, vector<1x128xf32>
    %43 = vector.broadcast %42 : vector<1x128xf32> to vector<8x128xf32>
    %44 = arith.addf %41, %43 : vector<8x128xf32>
    %c0_32 = arith.constant 0 : index
    %c0_33 = arith.constant 0 : index
    %45 = vector.load %arg10[%c0_32, %c0_33] : memref<128x128xf32, #tpu.memory_space<vmem>>, vector<128x128xf32>
    %cst_34 = arith.constant dense<0.000000e+00> : vector<8x128xf32>
    %46 = tpu.matmul %34, %45, %cst_34 {dimension_numbers = #tpu.dot_dimension_numbers<[1], [0], [0], [1], [0, 0, 1, 1], [], []>} : vector<8x128xf32>, vector<128x128xf32>, vector<8x128xf32> -> vector<8x128xf32>
    %c0_35 = arith.constant 0 : index
    %c0_36 = arith.constant 0 : index
    %47 = vector.load %arg13[%c0_35, %c0_36] : memref<1x128xf32, #tpu.memory_space<vmem>>, vector<1x128xf32>
    %48 = vector.broadcast %47 : vector<1x128xf32> to vector<8x128xf32>
    %49 = arith.addf %46, %48 : vector<8x128xf32>
    %50 = arith.mulf %7, %10 : vector<8x128xf32>
    %51 = arith.mulf %8, %11 : vector<8x128xf32>
    %52 = arith.addf %50, %51 : vector<8x128xf32>
    %53 = arith.mulf %9, %12 : vector<8x128xf32>
    %54 = arith.addf %52, %53 : vector<8x128xf32>
    %55 = arith.addf %0, %39 : vector<8x128xf32>
    %56 = arith.mulf %49, %54 : vector<8x128xf32>
    %57 = arith.addf %55, %56 : vector<8x128xf32>
    %c0_37 = arith.constant 0 : index
    %c0_38 = arith.constant 0 : index
    %58 = vector.load %arg14[%c0_37, %c0_38] : memref<8x128xf32, #tpu.memory_space<vmem>>, vector<8x128xf32>
    tpu.vector_store %arg14[%c0_37, %c0_38], %57 {strides = array<i32>} : memref<8x128xf32, #tpu.memory_space<vmem>>, vector<8x128xf32>,
    %59 = arith.mulf %44, %10 : vector<8x128xf32>
    %60 = arith.addf %2, %59 : vector<8x128xf32>
    %61 = arith.mulf %44, %11 : vector<8x128xf32>
    %62 = arith.addf %3, %61 : vector<8x128xf32>
    %63 = arith.mulf %44, %12 : vector<8x128xf32>
    %64 = arith.addf %4, %63 : vector<8x128xf32>
    %65 = tpu.concatenate %60, %62, %64 in 1 : vector<8x128xf32>, vector<8x128xf32>, vector<8x128xf32> -> vector<8x384xf32>
    %c0_39 = arith.constant 0 : index
    %c0_40 = arith.constant 0 : index
    %66 = vector.load %arg15[%c0_39, %c0_40] : memref<8x384xf32, #tpu.memory_space<vmem>>, vector<8x384xf32>
    tpu.vector_store %arg15[%c0_39, %c0_40], %65 {strides = array<i32>} : memref<8x384xf32, #tpu.memory_space<vmem>>, vector<8x384xf32>,
    return
  }
  func.func @transform_0(%arg0: i32) -> (i32, i32) {
    %c0_i32 = arith.constant 0 : i32
    %c0_i32_0 = arith.constant 0 : i32
    return %arg0, %c0_i32 : i32, i32
  }
  func.func @transform_1(%arg0: i32) -> (i32, i32) {
    %c0_i32 = arith.constant 0 : i32
    %c0_i32_0 = arith.constant 0 : i32
    return %arg0, %c0_i32 : i32, i32
  }
  func.func @transform_2(%arg0: i32) -> (i32, i32) {
    %c0_i32 = arith.constant 0 : i32
    %c0_i32_0 = arith.constant 0 : i32
    %c0_i32_1 = arith.constant 0 : i32
    return %c0_i32, %c0_i32_0 : i32, i32
  }
  func.func @transform_3(%arg0: i32) -> (i32, i32) {
    %c0_i32 = arith.constant 0 : i32
    %c0_i32_0 = arith.constant 0 : i32
    %c0_i32_1 = arith.constant 0 : i32
    return %c0_i32, %c0_i32_0 : i32, i32
  }
  func.func @transform_4(%arg0: i32) -> (i32, i32) {
    %c0_i32 = arith.constant 0 : i32
    %c0_i32_0 = arith.constant 0 : i32
    %c0_i32_1 = arith.constant 0 : i32
    return %c0_i32, %c0_i32_0 : i32, i32
  }
  func.func @transform_5(%arg0: i32) -> (i32, i32) {
    %c0_i32 = arith.constant 0 : i32
    %c0_i32_0 = arith.constant 0 : i32
    %c0_i32_1 = arith.constant 0 : i32
    return %c0_i32, %c0_i32_0 : i32, i32
  }
  func.func @transform_6(%arg0: i32) -> (i32, i32) {
    %c0_i32 = arith.constant 0 : i32
    %c0_i32_0 = arith.constant 0 : i32
    %c0_i32_1 = arith.constant 0 : i32
    return %c0_i32, %c0_i32_0 : i32, i32
  }
  func.func @transform_7(%arg0: i32) -> (i32, i32) {
    %c0_i32 = arith.constant 0 : i32
    %c0_i32_0 = arith.constant 0 : i32
    %c0_i32_1 = arith.constant 0 : i32
    return %c0_i32, %c0_i32_0 : i32, i32
  }
  func.func @transform_8(%arg0: i32) -> (i32, i32) {
    %c0_i32 = arith.constant 0 : i32
    %c0_i32_0 = arith.constant 0 : i32
    %c0_i32_1 = arith.constant 0 : i32
    return %c0_i32, %c0_i32_0 : i32, i32
  }
  func.func @transform_9(%arg0: i32) -> (i32, i32) {
    %c0_i32 = arith.constant 0 : i32
    %c0_i32_0 = arith.constant 0 : i32
    %c0_i32_1 = arith.constant 0 : i32
    return %c0_i32, %c0_i32_0 : i32, i32
  }
  func.func @transform_10(%arg0: i32) -> (i32, i32) {
    %c0_i32 = arith.constant 0 : i32
    %c0_i32_0 = arith.constant 0 : i32
    %c0_i32_1 = arith.constant 0 : i32
    return %c0_i32, %c0_i32_0 : i32, i32
  }
  func.func @transform_11(%arg0: i32) -> (i32, i32) {
    %c0_i32 = arith.constant 0 : i32
    %c0_i32_0 = arith.constant 0 : i32
    %c0_i32_1 = arith.constant 0 : i32
    return %c0_i32, %c0_i32_0 : i32, i32
  }
  func.func @transform_12(%arg0: i32) -> (i32, i32) {
    %c0_i32 = arith.constant 0 : i32
    %c0_i32_0 = arith.constant 0 : i32
    %c0_i32_1 = arith.constant 0 : i32
    return %c0_i32, %c0_i32_0 : i32, i32
  }
  func.func @transform_13(%arg0: i32) -> (i32, i32) {
    %c0_i32 = arith.constant 0 : i32
    %c0_i32_0 = arith.constant 0 : i32
    return %arg0, %c0_i32 : i32, i32
  }
  func.func @transform_14(%arg0: i32) -> (i32, i32) {
    %c0_i32 = arith.constant 0 : i32
    %c0_i32_0 = arith.constant 0 : i32
    return %arg0, %c0_i32 : i32, i32
  }
}

</mosaic_0001>

<bundles_post_ra>
// kernel: tpu_custom_call.1
= control target key start
LH: loop header
LB: loop body
LE: loop exit
PB: predicated region body
PF: predicated region fallthrough
CT: control target
= control target key end

     0   :  { %20 = vsyncpa [#allocation3], 0  ;;  %s2714_s0 = inlined_call_operand.hbm [shape: f32[8,128], index: 0, kind: input, shape index: {}]   ;;  %s2715_s1 = inlined_call_operand.hbm [shape: f32[8,384], index: 1, kind: input, shape index: {}]   ;;  %s2716_s2 = inlined_call_operand.hbm [shape: f32[128,128], index: 2, kind: input, shape index: {}]   ;;  %s2717_s3 = inlined_call_operand.hbm [shape: f32[128,128], index: 3, kind: input, shape index: {}]   ;;  %s2718_s4 = inlined_call_operand.hbm [shape: f32[128,128], index: 4, kind: input, shape index: {}]   ;;  %s2719_s5 = inlined_call_operand.hbm [shape: f32[128,128], index: 5, kind: input, shape index: {}]   ;;  %s2720_s6 = inlined_call_operand.vmem [shape: f32[1,128], index: 6, kind: input, shape index: {}]   ;;  %s2721_s7 = inlined_call_operand.hbm [shape: f32[128,128], index: 7, kind: input, shape index: {}]   ;;  %s2722_s8 = inlined_call_operand.hbm [shape: f32[128,128], index: 8, kind: input, shape index: {}]   ;;  %s2723_s9 = inlined_call_operand.hbm [shape: f32[128,128], index: 9, kind: input, shape index: {}]   ;;  %s2724_s10 = inlined_call_operand.vmem [shape: f32[1,128], index: 10, kind: input, shape index: {}]   ;;  %s2725_s11 = inlined_call_operand.vmem [shape: f32[1,128], index: 11, kind: input, shape index: {}]   ;;  %s2726_s12 = inlined_call_operand.vmem [shape: f32[1,128], index: 12, kind: input, shape index: {}]   ;;  %s2727_s13 = inlined_call_operand.hbm [shape: f32[8,128], index: 13, kind: output, shape index: {0}]   ;;  %s2728_s14 = inlined_call_operand.hbm [shape: f32[8,384], index: 14, kind: output, shape index: {1}]  }
   0x1   :  { %21 = vsyncpa [#allocation6], 0 }
   0x2   :  { %22 = vsyncpa [#allocation9], 0 }
   0x3   :  { %23 = vsyncpa [#allocation12], 0 }
   0x4   :  { %24 = vsyncpa [#allocation15], 0 }
   0x5   :  { %25 = vsyncpa [#allocation4], 0 }
   0x6   :  { %26 = vsyncpa [#allocation19], 0  ;;  %s2271_s29 = smov [#allocation5]   ;;  %s2015_s17 = scalar_lea.hbm %s2715_s1, 384 }
   0x7   :  { %s43_s30 = sshll.u32 %s2271_s29, 4  ;;  %p2016_p0 = scmp.ne.s32.totalorder %s2715_s1, %s2015_s17  ;;  %s44_s30 = int_to_ptr.vmem [resolvable:$true] %s43_s30 }
   0x8   :  { %p2019_p1 = scmp.lt.u32.totalorder %s2015_s17, %s2715_s1 }
   0xa   :  { %p2021_p2 = pnand %p2019_p1, %p2016_p0 }
   0xc   :  { %2024 = shalt.err (!%p2021_p2)
}
   0xd   :  { %s2025_s22 = scalar_lea.vmem %s44_s30, 384  ;;  %p2030_p4 = scmp.lt.s32.totalorder %s44_s30, %s44_s30 }
   0xe   :  { %p2026_p3 = scmp.ne.s32.totalorder %s44_s30, %s2025_s22  ;;  %p2031_p5 = scmp.lt.s32.totalorder %s2025_s22, %s2025_s22 }
  0x10   :  { %p2032_p6 = por %p2031_p5, %p2030_p4 }
  0x12   :  { %p2033_p7 = pnand %p2032_p6, %p2026_p3 }
  0x14   :  { %2036 = shalt.err (!%p2033_p7)
}
  0x15   :  { %46 = dma.hbm_to_vmem [thread:$0]  %s2715_s1, 384, %s44_s30, [#allocation6]  }
  0x16   :  { %s2272_s25 = smov [#allocation8]   ;;  %s2273_s27 = smov [#allocation11]  }
  0x17   :  { %s64_s26 = sshll.u32 %s2272_s25, 4  ;;  %s88_s28 = sshll.u32 %s2273_s27, 4  ;;  %s65_s26 = int_to_ptr.vmem [resolvable:$true] %s64_s26  ;;  %s89_s28 = int_to_ptr.vmem [resolvable:$true] %s88_s28 }
  0x18   :  { %s2037_s16 = scalar_lea.hbm %s2717_s3, 2048 }
  0x19   :  { %p2038_p8 = scmp.ne.s32.totalorder %s2717_s3, %s2037_s16  ;;  %p2041_p9 = scmp.lt.u32.totalorder %s2037_s16, %s2717_s3 }
  0x1b   :  { %p2043_p10 = pnand %p2041_p9, %p2038_p8 }
  0x1d   :  { %2046 = shalt.err (!%p2043_p10)
}
  0x1e   :  { %s2047_s1 = scalar_lea.vmem %s65_s26, 2048  ;;  %p2052_p12 = scmp.lt.s32.totalorder %s65_s26, %s65_s26 }
  0x1f   :  { %p2048_p11 = scmp.ne.s32.totalorder %s65_s26, %s2047_s1  ;;  %p2053_p13 = scmp.lt.s32.totalorder %s2047_s1, %s2047_s1 }
  0x21   :  { %p2054_p0 = por %p2053_p13, %p2052_p12 }
  0x23   :  { %p2055_p1 = pnand %p2054_p0, %p2048_p11 }
  0x25   :  { %2058 = shalt.err (!%p2055_p1)
}
  0x26   :  { %s2274_s30 = smov 128   ;;  %s2275_s21 = smov 8  }
  0x27   :  { %70 = dma.hbm_to_vmem [thread:$0]  %s2717_s3, 2048, %s65_s26, [#allocation9], %s2274_s30, %s2274_s30, %s2275_s21  }
  0x28   :  { %s2059_s27 = scalar_lea.hbm %s2719_s5, 2048 }
  0x29   :  { %p2060_p2 = scmp.ne.s32.totalorder %s2719_s5, %s2059_s27  ;;  %p2063_p3 = scmp.lt.u32.totalorder %s2059_s27, %s2719_s5 }
  0x2b   :  { %p2065_p4 = pnand %p2063_p3, %p2060_p2 }
  0x2d   :  { %2068 = shalt.err (!%p2065_p4)
}
  0x2e   :  { %s2069_s18 = scalar_lea.vmem %s89_s28, 2048  ;;  %p2074_p6 = scmp.lt.s32.totalorder %s89_s28, %s89_s28 }
  0x2f   :  { %p2070_p5 = scmp.ne.s32.totalorder %s89_s28, %s2069_s18  ;;  %p2075_p7 = scmp.lt.s32.totalorder %s2069_s18, %s2069_s18 }
  0x31   :  { %p2076_p8 = por %p2075_p7, %p2074_p6 }
  0x33   :  { %p2077_p9 = pnand %p2076_p8, %p2070_p5 }
  0x35   :  { %2080 = shalt.err (!%p2077_p9)
}
  0x36   :  { %94 = dma.hbm_to_vmem [thread:$0]  %s2719_s5, 2048, %s89_s28, [#allocation12], %s2274_s30, %s2274_s30, %s2275_s21  }
  0x37   :  { %s2276_s19 = smov [#allocation14]   ;;  %s2277_s1 = smov [#allocation2]  }
  0x38   :  { %s114_s20 = sshll.u32 %s2276_s19, 4  ;;  %s33_s22 = sshll.u32 %s2277_s1, 4  ;;  %s115_s20 = int_to_ptr.vmem [resolvable:$true] %s114_s20  ;;  %s34_s22 = int_to_ptr.vmem [resolvable:$true] %s33_s22 }
  0x39   :  { %s2081_s25 = scalar_lea.hbm %s2722_s8, 2048 }
  0x3a   :  { %p2082_p10 = scmp.ne.s32.totalorder %s2722_s8, %s2081_s25  ;;  %p2085_p11 = scmp.lt.u32.totalorder %s2081_s25, %s2722_s8 }
  0x3c   :  { %p2087_p12 = pnand %p2085_p11, %p2082_p10 }
  0x3e   :  { %2090 = shalt.err (!%p2087_p12)
}
  0x3f   :  { %s2091_s5 = scalar_lea.vmem %s115_s20, 2048  ;;  %p2096_p0 = scmp.lt.s32.totalorder %s115_s20, %s115_s20 }
  0x40   :  { %p2092_p13 = scmp.ne.s32.totalorder %s115_s20, %s2091_s5  ;;  %p2097_p1 = scmp.lt.s32.totalorder %s2091_s5, %s2091_s5 }
  0x42   :  { %p2098_p2 = por %p2097_p1, %p2096_p0 }
  0x44   :  { %p2099_p3 = pnand %p2098_p2, %p2092_p13 }
  0x46   :  { %2102 = shalt.err (!%p2099_p3)
}
  0x47   :  { %120 = dma.hbm_to_vmem [thread:$0]  %s2722_s8, 2048, %s115_s20, [#allocation15], %s2274_s30, %s2274_s30, %s2275_s21  }
  0x48   :  { %s2103_s26 = scalar_lea.hbm %s2714_s0, 128 }
  0x49   :  { %p2104_p4 = scmp.ne.s32.totalorder %s2714_s0, %s2103_s26  ;;  %p2107_p5 = scmp.lt.u32.totalorder %s2103_s26, %s2714_s0 }
  0x4b   :  { %p2109_p6 = pnand %p2107_p5, %p2104_p4 }
  0x4d   :  { %2112 = shalt.err (!%p2109_p6)
}
  0x4e   :  { %s2113_s25 = scalar_lea.vmem %s34_s22, 128  ;;  %p2118_p8 = scmp.lt.s32.totalorder %s34_s22, %s34_s22 }
  0x4f   :  { %p2114_p7 = scmp.ne.s32.totalorder %s34_s22, %s2113_s25  ;;  %p2119_p9 = scmp.lt.s32.totalorder %s2113_s25, %s2113_s25 }
  0x51   :  { %p2120_p10 = por %p2119_p9, %p2118_p8 }
  0x53   :  { %p2121_p11 = pnand %p2120_p10, %p2114_p7 }
  0x55   :  { %2124 = shalt.err (!%p2121_p11)
}
  0x56   :  { %36 = dma.hbm_to_vmem [thread:$0]  %s2714_s0, 128, %s34_s22, [#allocation3]  }
  0x57   :  { %s2278_s27 = smov [#allocation7]   ;;  %s2279_s15 = smov [#allocation10]  }
  0x58   :  { %s52_s29 = sshll.u32 %s2278_s27, 4  ;;  %s76_s16 = sshll.u32 %s2279_s15, 4  ;;  %s53_s29 = int_to_ptr.vmem [resolvable:$true] %s52_s29  ;;  %s77_s16 = int_to_ptr.vmem [resolvable:$true] %s76_s16 }
  0x59   :  { %s2125_s17 = scalar_lea.hbm %s2716_s2, 2048 }
  0x5a   :  { %p2126_p12 = scmp.ne.s32.totalorder %s2716_s2, %s2125_s17  ;;  %p2129_p13 = scmp.lt.u32.totalorder %s2125_s17, %s2716_s2 }
  0x5c   :  { %p2131_p0 = pnand %p2129_p13, %p2126_p12 }
  0x5e   :  { %2134 = shalt.err (!%p2131_p0)
}
  0x5f   :  { %s2135_s0 = scalar_lea.vmem %s53_s29, 2048  ;;  %p2140_p2 = scmp.lt.s32.totalorder %s53_s29, %s53_s29 }
  0x60   :  { %p2136_p1 = scmp.ne.s32.totalorder %s53_s29, %s2135_s0  ;;  %p2141_p3 = scmp.lt.s32.totalorder %s2135_s0, %s2135_s0 }
  0x62   :  { %p2142_p4 = por %p2141_p3, %p2140_p2 }
  0x64   :  { %p2143_p5 = pnand %p2142_p4, %p2136_p1 }
  0x66   :  { %2146 = shalt.err (!%p2143_p5)
}
  0x67   :  { %58 = dma.hbm_to_vmem [thread:$0]  %s2716_s2, 2048, %s53_s29, [#allocation6], %s2274_s30, %s2274_s30, %s2275_s21  }
  0x68   :  { %s2147_s25 = scalar_lea.hbm %s2718_s4, 2048 }
  0x69   :  { %p2148_p6 = scmp.ne.s32.totalorder %s2718_s4, %s2147_s25  ;;  %p2151_p7 = scmp.lt.u32.totalorder %s2147_s25, %s2718_s4 }
  0x6b   :  { %p2153_p8 = pnand %p2151_p7, %p2148_p6 }
  0x6d   :  { %2156 = shalt.err (!%p2153_p8)
}
  0x6e   :  { %s2157_s5 = scalar_lea.vmem %s77_s16, 2048  ;;  %p2162_p10 = scmp.lt.s32.totalorder %s77_s16, %s77_s16 }
  0x6f   :  { %p2158_p9 = scmp.ne.s32.totalorder %s77_s16, %s2157_s5  ;;  %p2163_p11 = scmp.lt.s32.totalorder %s2157_s5, %s2157_s5 }
  0x71   :  { %p2164_p12 = por %p2163_p11, %p2162_p10 }
  0x73   :  { %p2165_p13 = pnand %p2164_p12, %p2158_p9 }
  0x75   :  { %2168 = shalt.err (!%p2165_p13)
}
  0x76   :  { %82 = dma.hbm_to_vmem [thread:$0]  %s2718_s4, 2048, %s77_s16, [#allocation9], %s2274_s30, %s2274_s30, %s2275_s21  }
  0x77   :  { %s2280_s28 = smov [#allocation13]   ;;  %s2281_s18 = smov [#allocation16]  }
  0x78   :  { %s102_s17 = sshll.u32 %s2280_s28, 4  ;;  %s126_s3 = sshll.u32 %s2281_s18, 4  ;;  %s103_s17 = int_to_ptr.vmem [resolvable:$true] %s102_s17  ;;  %s127_s3 = int_to_ptr.vmem [resolvable:$true] %s126_s3 }
  0x79   :  { %s2169_s0 = scalar_lea.hbm %s2721_s7, 2048 }
  0x7a   :  { %p2170_p0 = scmp.ne.s32.totalorder %s2721_s7, %s2169_s0  ;;  %p2173_p1 = scmp.lt.u32.totalorder %s2169_s0, %s2721_s7 }
  0x7c   :  { %p2175_p2 = pnand %p2173_p1, %p2170_p0 }
  0x7e   :  { %2178 = shalt.err (!%p2175_p2)
}
  0x7f   :  { %s2179_s4 = scalar_lea.vmem %s103_s17, 2048  ;;  %p2184_p4 = scmp.lt.s32.totalorder %s103_s17, %s103_s17 }
  0x80   :  { %p2180_p3 = scmp.ne.s32.totalorder %s103_s17, %s2179_s4  ;;  %p2185_p5 = scmp.lt.s32.totalorder %s2179_s4, %s2179_s4 }
  0x82   :  { %p2186_p6 = por %p2185_p5, %p2184_p4 }
  0x84   :  { %p2187_p7 = pnand %p2186_p6, %p2180_p3 }
  0x86   :  { %2190 = shalt.err (!%p2187_p7)
}
  0x87   :  { %108 = dma.hbm_to_vmem [thread:$0]  %s2721_s7, 2048, %s103_s17, [#allocation12], %s2274_s30, %s2274_s30, %s2275_s21  }
  0x88   :  { %s2191_s27 = scalar_lea.hbm %s2723_s9, 2048 }
  0x89   :  { %p2192_p8 = scmp.ne.s32.totalorder %s2723_s9, %s2191_s27  ;;  %p2195_p9 = scmp.lt.u32.totalorder %s2191_s27, %s2723_s9 }
  0x8b   :  { %p2197_p10 = pnand %p2195_p9, %p2192_p8 }
  0x8d   :  { %2200 = shalt.err (!%p2197_p10)
}
  0x8e   :  { %s2201_s28 = scalar_lea.vmem %s127_s3, 2048  ;;  %p2206_p12 = scmp.lt.s32.totalorder %s127_s3, %s127_s3 }
  0x8f   :  { %p2202_p11 = scmp.ne.s32.totalorder %s127_s3, %s2201_s28  ;;  %p2207_p13 = scmp.lt.s32.totalorder %s2201_s28, %s2201_s28 }
  0x91   :  { %p2208_p0 = por %p2207_p13, %p2206_p12 }
  0x93   :  { %p2209_p1 = pnand %p2208_p0, %p2202_p11 }
  0x95   :  { %2212 = shalt.err (!%p2209_p1)
}
  0x96   :  { %132 = dma.hbm_to_vmem [thread:$0]  %s2723_s9, 2048, %s127_s3, [#allocation15], %s2274_s30, %s2274_s30, %s2275_s21  }
  0x97   :  { %2257 = dma.done.wait [#allocation3], 128  }
  0x98   :  { %2258 = vsyncadd [#allocation3], 4294967168 }
  0x99   :  { %2259 = dma.done.wait [#allocation6], 2432  }
  0x9a   :  { %2260 = vsyncadd [#allocation6], 4294964864 }
  0x9b   :  { %2261 = dma.done.wait [#allocation9], 4096  }
  0x9c   :  { %2262 = vsyncadd [#allocation9], 4294963200 }
  0x9d   :  { %2263 = dma.done.wait [#allocation12], 4096  }
  0x9e   :  { %2264 = vsyncadd [#allocation12], 4294963200 }
  0x9f   :  { %2265 = dma.done.wait [#allocation15], 4096  }
  0xa0   :  { %2266 = vsyncadd [#allocation15], 4294963200  ;;  %v2282_v0 = vmov 0.0|0.0   ;;  %vm2283_vm0 = vmmov 0   ;;  %v2284_v1 = vmov 0.0   ;;  %v170_v2 = vld [vmem:[#allocation7] sm:$0xff] }
  0xa1   :  { %1729 = vmatprep.subr.bf16.mxu0 %v2282_v0  ;;  %1753 = vmatprep.subr.bf16.mxu1 %v2282_v0  ;;  %v171_v3 = vld [vmem:[#allocation7 + $0x8] sm:$0xff]  ;;  %v172_v4 = vld [vmem:[#allocation7 + $0x10] sm:$0xff]  ;;  %v173_v6 = vld [vmem:[#allocation7 + $0x18] sm:$0xff]  ;;  %s2285_s18 = smov [#allocation18]  }
  0xa2   :  { %1376 = vmatprep.mubr.msk.f32.mxu0 %vm2283_vm0, %v2284_v1  ;;  %1411 = vmatprep.mubr.msk.f32.mxu1 %vm2283_vm0, %v2284_v1  ;;  %v1730_v5 = vpack.c.bf16 %v171_v3, %v170_v2  ;;  %v2497_v7 = vpack.c.bf16 %v173_v6, %v172_v4  ;;  %v174_v8 = vld [vmem:[#allocation7 + $0x20] sm:$0xff]  ;;  %v175_v9 = vld [vmem:[#allocation7 + $0x28] sm:$0xff]  ;;  %v176_v11 = vld [vmem:[#allocation7 + $0x30] sm:$0xff]  ;;  %s1135_s3 = sshll.u32 %s2285_s18, 4  ;;  %s1136_s3 = int_to_ptr.vmem [resolvable:$true] %s1135_s3 }
  0xa3   :  { %v2503_v10 = vpack.c.bf16 %v175_v9, %v174_v8  ;;  %v177_v12 = vld [vmem:[#allocation7 + $0x38] sm:$0xff]  ;;  %v178_v14 = vld [vmem:[#allocation7 + $0x40] sm:$0xff]  ;;  %v179_v15 = vld [vmem:[#allocation7 + $0x48] sm:$0xff]  ;;  %p2218_p3 = scmp.lt.s32.totalorder %s1136_s3, %s1136_s3 }
  0xa4   :  { %1731 = vmatpush3.bf16.msra.mxu0 %v1730_v5  ;;  %1755 = vmatpush3.bf16.msra.mxu1 %v1730_v5  ;;  %v2509_v13 = vpack.c.bf16 %v177_v12, %v176_v11  ;;  %v2515_v16 = vpack.c.bf16 %v179_v15, %v178_v14  ;;  %v180_v17 = vld [vmem:[#allocation7 + $0x50] sm:$0xff]  ;;  %v181_v18 = vld [vmem:[#allocation7 + $0x58] sm:$0xff]  ;;  %v182_v20 = vld [vmem:[#allocation7 + $0x60] sm:$0xff] }
  0xa5   :  { %1732 = vmatprep.subr.bf16.mxu0 %v2282_v0  ;;  %1756 = vmatprep.subr.bf16.mxu1 %v2282_v0  ;;  %v2521_v19 = vpack.c.bf16 %v181_v18, %v180_v17  ;;  %v183_v21 = vld [vmem:[#allocation7 + $0x68] sm:$0xff]  ;;  %v184_v23 = vld [vmem:[#allocation7 + $0x70] sm:$0xff]  ;;  %v185_v24 = vld [vmem:[#allocation7 + $0x78] sm:$0xff] }
  0xa6   :  { %v2527_v22 = vpack.c.bf16 %v183_v21, %v182_v20  ;;  %v2533_v25 = vpack.c.bf16 %v185_v24, %v184_v23  ;;  %v186_v26 = vld [vmem:[#allocation8] sm:$0xff]  ;;  %v187_v27 = vld [vmem:[#allocation8 + $0x8] sm:$0xff]  ;;  %v2541_v29 = vld [vmem:[#allocation5 + $0x8] sm:$0xff] }
  0xa7   :  { %v2539_v28 = vld [vmem:[#allocation5] sm:$0xff]  ;;  %v2543_v30 = vpack.c.bf16 %v187_v27, %v186_v26  ;;  %v188_v31 = vld [vmem:[#allocation8 + $0x10] sm:$0xff]  ;;  %v189_v32 = vld [vmem:[#allocation8 + $0x18] sm:$0xff] }
  0xa8   :  { %1734 = vmatpush3.bf16.msra.mxu0 %v2497_v7  ;;  %1758 = vmatpush3.bf16.msra.mxu1 %v2497_v7  ;;  %v1805_v33 = vpack.c.bf16 %v189_v32, %v188_v31  ;;  %v190_v34 = vld [vmem:[#allocation8 + $0x20] sm:$0xff]  ;;  %v191_v35 = vld [vmem:[#allocation8 + $0x28] sm:$0xff]  ;;  %v192_v37 = vld [vmem:[#allocation8 + $0x30] sm:$0xff] }
  0xa9   :  { %1735 = vmatprep.subr.bf16.mxu0 %v2282_v0  ;;  %1759 = vmatprep.subr.bf16.mxu1 %v2282_v0  ;;  %v1808_v36 = vpack.c.bf16 %v191_v35, %v190_v34  ;;  %v193_v38 = vld [vmem:[#allocation8 + $0x38] sm:$0xff]  ;;  %v194_v40 = vld [vmem:[#allocation8 + $0x40] sm:$0xff]  ;;  %v195_v41 = vld [vmem:[#allocation8 + $0x48] sm:$0xff] }
  0xaa   :  { %v1811_v39 = vpack.c.bf16 %v193_v38, %v192_v37  ;;  %v1814_v42 = vpack.c.bf16 %v195_v41, %v194_v40  ;;  %v196_v43 = vld [vmem:[#allocation8 + $0x50] sm:$0xff]  ;;  %v197_v44 = vld [vmem:[#allocation8 + $0x58] sm:$0xff]  ;;  %v198_v46 = vld [vmem:[#allocation8 + $0x60] sm:$0xff] }
  0xab   :  { %v1817_v45 = vpack.c.bf16 %v197_v44, %v196_v43  ;;  %v199_v47 = vld [vmem:[#allocation8 + $0x68] sm:$0xff]  ;;  %v200_v49 = vld [vmem:[#allocation8 + $0x70] sm:$0xff]  ;;  %v201_v50 = vld [vmem:[#allocation8 + $0x78] sm:$0xff] }
  0xac   :  { %1737 = vmatpush3.bf16.msra.mxu0 %v2503_v10  ;;  %1761 = vmatpush3.bf16.msra.mxu1 %v2503_v10  ;;  %v1820_v48 = vpack.c.bf16 %v199_v47, %v198_v46  ;;  %v1823_v51 = vpack.c.bf16 %v201_v50, %v200_v49  ;;  %v2575_v52 = vld [vmem:[#allocation5 + $0x10] sm:$0xff]  ;;  %v635_v53 = vld [vmem:[#allocation10] sm:$0xff]  ;;  %v636_v54 = vld [vmem:[#allocation10 + $0x8] sm:$0xff] }
  0xad   :  { %1738 = vmatprep.subr.bf16.mxu0 %v2282_v0  ;;  %1762 = vmatprep.subr.bf16.mxu1 %v2282_v0  ;;  %v651_v55 = vld [vmem:[#allocation11] sm:$0xff]  ;;  %v1898_v56 = vpack.c.bf16 %v636_v54, %v635_v53  ;;  %v652_v57 = vld [vmem:[#allocation11 + $0x8] sm:$0xff]  ;;  %v637_v58 = vld [vmem:[#allocation10 + $0x10] sm:$0xff] }
  0xae   :  { %v638_v59 = vld [vmem:[#allocation10 + $0x18] sm:$0xff]  ;;  %v1874_v60 = vpack.c.bf16 %v652_v57, %v651_v55  ;;  %v653_v61 = vld [vmem:[#allocation11 + $0x10] sm:$0xff]  ;;  %v639_v3 = vld [vmem:[#allocation10 + $0x20] sm:$0xff] }
  0xaf   :  { %v654_v62 = vld [vmem:[#allocation11 + $0x18] sm:$0xff]  ;;  %v1901_v63 = vpack.c.bf16 %v638_v59, %v637_v58  ;;  %v640_v4 = vld [vmem:[#allocation10 + $0x28] sm:$0xff]  ;;  %v641_v9 = vld [vmem:[#allocation10 + $0x30] sm:$0xff] }
  0xb0   :  { %1740 = vmatpush3.bf16.msra.mxu0 %v2509_v13  ;;  %1764 = vmatpush3.bf16.msra.mxu1 %v2509_v13  ;;  %v1877_v2 = vpack.c.bf16 %v654_v62, %v653_v61  ;;  %v656_v6 = vld [vmem:[#allocation11 + $0x28] sm:$0xff]  ;;  %v657_v12 = vld [vmem:[#allocation11 + $0x30] sm:$0xff]  ;;  %v643_v15 = vld [vmem:[#allocation10 + $0x40] sm:$0xff] }
  0xb1   :  { %1741 = vmatprep.subr.bf16.mxu0 %v2282_v0  ;;  %1765 = vmatprep.subr.bf16.mxu1 %v2282_v0  ;;  %v659_v18 = vld [vmem:[#allocation11 + $0x40] sm:$0xff]  ;;  %v645_v21 = vld [vmem:[#allocation10 + $0x50] sm:$0xff]  ;;  %v664_v32 = vld [vmem:[#allocation11 + $0x68] sm:$0xff] }
  0xb2   :  { %v661_v23 = vld [vmem:[#allocation11 + $0x50] sm:$0xff]  ;;  %v647_v27 = vld [vmem:[#allocation10 + $0x60] sm:$0xff]  ;;  %v666_v38 = vld [vmem:[#allocation11 + $0x78] sm:$0xff] }
  0xb3   :  { %v663_v31 = vld [vmem:[#allocation11 + $0x60] sm:$0xff]  ;;  %v649_v35 = vld [vmem:[#allocation10 + $0x70] sm:$0xff] }
  0xb4   :  { %1743 = vmatpush3.bf16.msra.mxu0 %v2515_v16  ;;  %1767 = vmatpush3.bf16.msra.mxu1 %v2515_v16  ;;  %v1892_v34 = vpack.c.bf16 %v664_v32, %v663_v31  ;;  %v665_v37 = vld [vmem:[#allocation11 + $0x70] sm:$0xff]  ;;  %v2623_v41 = vld [vmem:[#allocation2] sm:$0xff]  ;;  %v829_v32 = vld [vmem:[#allocation13 + $0x38] sm:$0xff] }
  0xb5   :  { %1744 = vmatprep.subr.bf16.mxu0 %v2282_v0  ;;  %1768 = vmatprep.subr.bf16.mxu1 %v2282_v0  ;;  %v1895_v40 = vpack.c.bf16 %v666_v38, %v665_v37  ;;  %v828_v31 = vld [vmem:[#allocation13 + $0x30] sm:$0xff]  ;;  %v830_v37 = vld [vmem:[#allocation13 + $0x40] sm:$0xff]  ;;  %v831_v38 = vld [vmem:[#allocation13 + $0x48] sm:$0xff] }
  0xb8   :  { %1746 = vmatpush3.bf16.msra.mxu0 %v2521_v19  ;;  %1770 = vmatpush3.bf16.msra.mxu1 %v2521_v19 }
  0xb9   :  { %1747 = vmatprep.subr.bf16.mxu0 %v2282_v0  ;;  %1771 = vmatprep.subr.bf16.mxu1 %v2282_v0 }
  0xbc   :  { %1749 = vmatpush3.bf16.msra.mxu0 %v2527_v22  ;;  %1773 = vmatpush3.bf16.msra.mxu1 %v2527_v22 }
  0xbd   :  { %1750 = vmatprep.subr.bf16.mxu0 %v2282_v0  ;;  %1774 = vmatprep.subr.bf16.mxu1 %v2282_v0 }
  0xc0   :  { %1752 = vmatpush3.bf16.msra.mxu0 %v2533_v25  ;;  %1776 = vmatpush3.bf16.msra.mxu1 %v2533_v25 }
  0xc1   :  { %1777 = vmatprep.subr.bf16.mxu0 %v2282_v0  ;;  %1801 = vmatprep.subr.bf16.mxu1 %v2282_v0 }
  0xc3   :  { %1377 = vmatmul.mubr.f32.vlgmr.msra.gmra.mrb[0].mxu0 %v2539_v28  ;;  %1412 = vmatmul.mubr.f32.vlgmr.msra.gmra.mrb[0].mxu1 %v2541_v29 }
  0xc4   :  { %1779 = vmatpush3.bf16.msra.mxu0 %v1730_v5  ;;  %1803 = vmatpush3.bf16.msra.mxu1 %v2543_v30  ;;  %v655_v5 = vld [vmem:[#allocation11 + $0x20] sm:$0xff] }
  0xc5   :  { %1780 = vmatprep.subr.bf16.mxu0 %v2282_v0  ;;  %1804 = vmatprep.subr.bf16.mxu1 %v2282_v0  ;;  %v1880_v8 = vpack.c.bf16 %v656_v6, %v655_v5 }
  0xc6   :  { %1446 = vmatprep.mubr.msk.f32.mxu0 %vm2283_vm0, %v2284_v1  ;;  %1481 = vmatprep.mubr.msk.f32.mxu1 %vm2283_vm0, %v2284_v1 }
  0xc8   :  { %1782 = vmatpush3.bf16.msra.mxu0 %v2497_v7  ;;  %1806 = vmatpush3.bf16.msra.mxu1 %v1805_v33  ;;  %v1904_v7 = vpack.c.bf16 %v640_v4, %v639_v3 }
  0xc9   :  { %1783 = vmatprep.subr.bf16.mxu0 %v2282_v0  ;;  %1807 = vmatprep.subr.bf16.mxu1 %v2282_v0 }
  0xcc   :  { %1785 = vmatpush3.bf16.msra.mxu0 %v2503_v10  ;;  %1809 = vmatpush3.bf16.msra.mxu1 %v1808_v36  ;;  %v642_v10 = vld [vmem:[#allocation10 + $0x38] sm:$0xff] }
  0xcd   :  { %1786 = vmatprep.subr.bf16.mxu0 %v2282_v0  ;;  %1810 = vmatprep.subr.bf16.mxu1 %v2282_v0  ;;  %v1907_v11 = vpack.c.bf16 %v642_v10, %v641_v9  ;;  %v822_v9 = vld [vmem:[#allocation13] sm:$0xff]  ;;  %v823_v10 = vld [vmem:[#allocation13 + $0x8] sm:$0xff] }
  0xd0   :  { %1788 = vmatpush3.bf16.msra.mxu0 %v2509_v13  ;;  %1812 = vmatpush3.bf16.msra.mxu1 %v1811_v39  ;;  %v658_v13 = vld [vmem:[#allocation11 + $0x38] sm:$0xff] }
  0xd1   :  { %1789 = vmatprep.subr.bf16.mxu0 %v2282_v0  ;;  %1813 = vmatprep.subr.bf16.mxu1 %v2282_v0  ;;  %v1883_v14 = vpack.c.bf16 %v658_v13, %v657_v12  ;;  %v1922_v12 = vpack.c.bf16 %v823_v10, %v822_v9  ;;  %v915_v13 = vld [vmem:[#allocation14] sm:$0xff] }
  0xd4   :  { %1791 = vmatpush3.bf16.msra.mxu0 %v2515_v16  ;;  %1815 = vmatpush3.bf16.msra.mxu1 %v1814_v42  ;;  %v644_v16 = vld [vmem:[#allocation10 + $0x48] sm:$0xff] }
  0xd5   :  { %1792 = vmatprep.subr.bf16.mxu0 %v2282_v0  ;;  %1816 = vmatprep.subr.bf16.mxu1 %v2282_v0  ;;  %v1910_v17 = vpack.c.bf16 %v644_v16, %v643_v15 }
  0xd8   :  { %1794 = vmatpush3.bf16.msra.mxu0 %v2521_v19  ;;  %1818 = vmatpush3.bf16.msra.mxu1 %v1817_v45  ;;  %v660_v19 = vld [vmem:[#allocation11 + $0x48] sm:$0xff] }
  0xd9   :  { %1795 = vmatprep.subr.bf16.mxu0 %v2282_v0  ;;  %1819 = vmatprep.subr.bf16.mxu1 %v2282_v0  ;;  %v1886_v20 = vpack.c.bf16 %v660_v19, %v659_v18  ;;  %v825_v18 = vld [vmem:[#allocation13 + $0x18] sm:$0xff] }
  0xdc   :  { %1797 = vmatpush3.bf16.msra.mxu0 %v2527_v22  ;;  %1821 = vmatpush3.bf16.msra.mxu1 %v1820_v48  ;;  %v646_v22 = vld [vmem:[#allocation10 + $0x58] sm:$0xff] }
  0xdd   :  { %1798 = vmatprep.subr.bf16.mxu0 %v2282_v0  ;;  %1822 = vmatprep.subr.bf16.mxu1 %v2282_v0  ;;  %v1913_v24 = vpack.c.bf16 %v646_v22, %v645_v21  ;;  %v918_v21 = vld [vmem:[#allocation14 + $0x18] sm:$0xff] }
  0xe0   :  { %1800 = vmatpush3.bf16.msra.mxu0 %v2533_v25  ;;  %1824 = vmatpush3.bf16.msra.mxu1 %v1823_v51  ;;  %v662_v25 = vld [vmem:[#allocation11 + $0x58] sm:$0xff] }
  0xe1   :  { %1825 = vmatprep.subr.bf16.mxu0 %v2282_v0  ;;  %1849 = vmatprep.subr.bf16.mxu1 %v2282_v0  ;;  %v1889_v26 = vpack.c.bf16 %v662_v25, %v661_v23  ;;  %v826_v23 = vld [vmem:[#allocation13 + $0x20] sm:$0xff] }
  0xe3   :  { %1447 = vmatmul.mubr.f32.vlgmr.msra.gmra.mrb[2].mxu0 %v2575_v52  ;;  %1482 = vmatmul.mubr.f32.vlgmr.msra.gmra.mrb[2].mxu1 %v2539_v28 }
  0xe4   :  { %1827 = vmatpush3.bf16.msra.mxu0 %v2543_v30  ;;  %1851 = vmatpush3.bf16.msra.mxu1 %v2543_v30  ;;  %v648_v30 = vld [vmem:[#allocation10 + $0x68] sm:$0xff] }
  0xe5   :  { %1828 = vmatprep.subr.bf16.mxu0 %v2282_v0  ;;  %1852 = vmatprep.subr.bf16.mxu1 %v2282_v0 }
  0xe6   :  { %1516 = vmatprep.mubr.msk.f32.mxu0 %vm2283_vm0, %v2284_v1  ;;  %1551 = vmatprep.mubr.msk.f32.mxu1 %vm2283_vm0, %v2284_v1 }
  0xe8   :  { %1830 = vmatpush3.bf16.msra.mxu0 %v1805_v33  ;;  %1854 = vmatpush3.bf16.msra.mxu1 %v1805_v33  ;;  %v1916_v33 = vpack.c.bf16 %v648_v30, %v647_v27  ;;  %v920_v27 = vld [vmem:[#allocation14 + $0x28] sm:$0xff] }
  0xe9   :  { %1831 = vmatprep.subr.bf16.mxu0 %v2282_v0  ;;  %1855 = vmatprep.subr.bf16.mxu1 %v2282_v0 }
  0xec   :  { %1833 = vmatpush3.bf16.msra.mxu0 %v1808_v36  ;;  %1857 = vmatpush3.bf16.msra.mxu1 %v1808_v36  ;;  %v650_v36 = vld [vmem:[#allocation10 + $0x78] sm:$0xff] }
  0xed   :  { %1834 = vmatprep.subr.bf16.mxu0 %v2282_v0  ;;  %1858 = vmatprep.subr.bf16.mxu1 %v2282_v0 }
  0xf0   :  { %1836 = vmatpush3.bf16.msra.mxu0 %v1811_v39  ;;  %1860 = vmatpush3.bf16.msra.mxu1 %v1811_v39  ;;  %v1919_v39 = vpack.c.bf16 %v650_v36, %v649_v35  ;;  %v922_v35 = vld [vmem:[#allocation14 + $0x38] sm:$0xff] }
  0xf1   :  { %1837 = vmatprep.subr.bf16.mxu0 %v2282_v0  ;;  %1861 = vmatprep.subr.bf16.mxu1 %v2282_v0 }
  0xf4   :  { %1839 = vmatpush3.bf16.msra.mxu0 %v1814_v42  ;;  %1863 = vmatpush3.bf16.msra.mxu1 %v1814_v42 }
  0xf5   :  { %1840 = vmatprep.subr.bf16.mxu0 %v2282_v0  ;;  %1864 = vmatprep.subr.bf16.mxu1 %v2282_v0 }
  0xf8   :  { %1842 = vmatpush3.bf16.msra.mxu0 %v1817_v45  ;;  %1866 = vmatpush3.bf16.msra.mxu1 %v1817_v45 }
  0xf9   :  { %1843 = vmatprep.subr.bf16.mxu0 %v2282_v0  ;;  %1867 = vmatprep.subr.bf16.mxu1 %v2282_v0 }
  0xfc   :  { %1845 = vmatpush3.bf16.msra.mxu0 %v1820_v48  ;;  %1869 = vmatpush3.bf16.msra.mxu1 %v1820_v48 }
  0xfd   :  { %1846 = vmatprep.subr.bf16.mxu0 %v2282_v0  ;;  %1870 = vmatprep.subr.bf16.mxu1 %v2282_v0 }
 0x100   :  { %1848 = vmatpush3.bf16.msra.mxu0 %v1823_v51  ;;  %1872 = vmatpush3.bf16.msra.mxu1 %v1823_v51 }
 0x101   :  { %1897 = vmatprep.subr.bf16.mxu1 %v2282_v0  ;;  %1873 = vmatprep.subr.bf16.mxu0 %v2282_v0 }
 0x103   :  { %1517 = vmatmul.mubr.f32.vlgmr.msra.gmra.mrb[4].mxu0 %v2541_v29  ;;  %1552 = vmatmul.mubr.f32.vlgmr.msra.gmra.mrb[4].mxu1 %v2575_v52 }
 0x104   :  { %1621 = vmatprep.mubr.msk.f32.mxu1 %vm2283_vm0, %v2284_v1  ;;  %1586 = vmatprep.mubr.msk.f32.mxu0 %vm2283_vm0, %v2284_v1 }
 0x105   :  { %1899 = vmatpush3.bf16.msra.mxu1 %v1898_v56  ;;  %1875 = vmatpush3.bf16.msra.mxu0 %v1874_v60 }
 0x106   :  { %1900 = vmatprep.subr.bf16.mxu1 %v2282_v0  ;;  %1876 = vmatprep.subr.bf16.mxu0 %v2282_v0 }
 0x109   :  { %1902 = vmatpush3.bf16.msra.mxu1 %v1901_v63  ;;  %1878 = vmatpush3.bf16.msra.mxu0 %v1877_v2 }
 0x10a   :  { %1903 = vmatprep.subr.bf16.mxu1 %v2282_v0  ;;  %1879 = vmatprep.subr.bf16.mxu0 %v2282_v0 }
 0x10d   :  { %1905 = vmatpush3.bf16.msra.mxu1 %v1904_v7  ;;  %1881 = vmatpush3.bf16.msra.mxu0 %v1880_v8 }
 0x10e   :  { %1906 = vmatprep.subr.bf16.mxu1 %v2282_v0  ;;  %1882 = vmatprep.subr.bf16.mxu0 %v2282_v0 }
 0x111   :  { %1908 = vmatpush3.bf16.msra.mxu1 %v1907_v11  ;;  %1884 = vmatpush3.bf16.msra.mxu0 %v1883_v14  ;;  %v916_v14 = vld [vmem:[#allocation14 + $0x8] sm:$0xff] }
 0x112   :  { %1909 = vmatprep.subr.bf16.mxu1 %v2282_v0  ;;  %1885 = vmatprep.subr.bf16.mxu0 %v2282_v0  ;;  %v1946_v16 = vpack.c.bf16 %v916_v14, %v915_v13  ;;  %v1008_v14 = vld [vmem:[#allocation16] sm:$0xff] }
 0x115   :  { %1911 = vmatpush3.bf16.msra.mxu1 %v1910_v17  ;;  %1887 = vmatpush3.bf16.msra.mxu0 %v1886_v20  ;;  %v824_v17 = vld [vmem:[#allocation13 + $0x10] sm:$0xff] }
 0x116   :  { %1912 = vmatprep.subr.bf16.mxu1 %v2282_v0  ;;  %1888 = vmatprep.subr.bf16.mxu0 %v2282_v0  ;;  %v1925_v19 = vpack.c.bf16 %v825_v18, %v824_v17  ;;  %v917_v20 = vld [vmem:[#allocation14 + $0x10] sm:$0xff] }
 0x117   :  { %v1949_v22 = vpack.c.bf16 %v918_v21, %v917_v20  ;;  %v1011_v20 = vld [vmem:[#allocation16 + $0x18] sm:$0xff] }
 0x119   :  { %1914 = vmatpush3.bf16.msra.mxu1 %v1913_v24  ;;  %1890 = vmatpush3.bf16.msra.mxu0 %v1889_v26  ;;  %v827_v24 = vld [vmem:[#allocation13 + $0x28] sm:$0xff]  ;;  %v919_v26 = vld [vmem:[#allocation14 + $0x20] sm:$0xff] }
 0x11a   :  { %1915 = vmatprep.subr.bf16.mxu1 %v2282_v0  ;;  %1891 = vmatprep.subr.bf16.mxu0 %v2282_v0  ;;  %v1928_v25 = vpack.c.bf16 %v827_v24, %v826_v23  ;;  %v1952_v30 = vpack.c.bf16 %v920_v27, %v919_v26  ;;  %v1014_v24 = vld [vmem:[#allocation16 + $0x30] sm:$0xff]  ;;  %v1016_v27 = vld [vmem:[#allocation16 + $0x40] sm:$0xff] }
 0x11d   :  { %1917 = vmatpush3.bf16.msra.mxu1 %v1916_v33  ;;  %1893 = vmatpush3.bf16.msra.mxu0 %v1892_v34  ;;  %v1931_v33 = vpack.c.bf16 %v829_v32, %v828_v31  ;;  %v921_v34 = vld [vmem:[#allocation14 + $0x30] sm:$0xff]  ;;  %v1019_v32 = vld [vmem:[#allocation16 + $0x58] sm:$0xff] }
 0x11e   :  { %1918 = vmatprep.subr.bf16.mxu1 %v2282_v0  ;;  %1894 = vmatprep.subr.bf16.mxu0 %v2282_v0  ;;  %v1955_v36 = vpack.c.bf16 %v922_v35, %v921_v34  ;;  %v1020_v34 = vld [vmem:[#allocation16 + $0x60] sm:$0xff]  ;;  %v1021_v35 = vld [vmem:[#allocation16 + $0x68] sm:$0xff] }
 0x121   :  { %1920 = vmatpush3.bf16.msra.mxu1 %v1919_v39  ;;  %1896 = vmatpush3.bf16.msra.mxu0 %v1895_v40  ;;  %v1934_v39 = vpack.c.bf16 %v831_v38, %v830_v37  ;;  %v923_v40 = vld [vmem:[#allocation14 + $0x40] sm:$0xff]  ;;  %v1022_v37 = vld [vmem:[#allocation16 + $0x70] sm:$0xff]  ;;  %v1023_v38 = vld [vmem:[#allocation16 + $0x78] sm:$0xff] }
 0x122   :  { %1945 = vmatprep.subr.bf16.mxu1 %v2282_v0  ;;  %1921 = vmatprep.subr.bf16.mxu0 %v2282_v0 }
 0x124   :  { %1622 = vmatmul.mubr.f32.vlgmr.msra.gmra.mrb[6].mxu1 %v2623_v41 }
 0x125   :  { %1691 = vmatprep.mubr.msk.f32.mxu1 %vm2283_vm0, %v2284_v1  ;;  %1947 = vmatpush3.bf16.msra.mxu1 %v1946_v16 }
 0x126   :  { %1948 = vmatprep.subr.bf16.mxu1 %v2282_v0 }
 0x129   :  { %1950 = vmatpush3.bf16.msra.mxu1 %v1949_v22  ;;  %v1013_v22 = vld [vmem:[#allocation16 + $0x28] sm:$0xff] }
 0x12a   :  { %1951 = vmatprep.subr.bf16.mxu1 %v2282_v0 }
 0x12d   :  { %1953 = vmatpush3.bf16.msra.mxu1 %v1952_v30  ;;  %v1017_v30 = vld [vmem:[#allocation16 + $0x48] sm:$0xff] }
 0x12e   :  { %1954 = vmatprep.subr.bf16.mxu1 %v2282_v0  ;;  %v1982_v31 = vpack.c.bf16 %v1017_v30, %v1016_v27 }
 0x131   :  { %1956 = vmatpush3.bf16.msra.mxu1 %v1955_v36  ;;  %v1988_v36 = vpack.c.bf16 %v1021_v35, %v1020_v34 }
 0x132   :  { %1957 = vmatprep.subr.bf16.mxu1 %v2282_v0 }
 0x196   :  { %v268_v42 = vpop.f32.mrb[0].mxu0  ;;  %v338_v43 = vpop.f32.mrb[0].mxu1 }
 0x197   :  { %v622_v44 = vmul.f32 %v268_v42, %v268_v42  ;;  %v1378_v45 = vpop.f32.mrb[1].mxu0  ;;  %v623_v46 = vmul.f32 %v338_v43, %v338_v43  ;;  %v1413_v47 = vpop.f32.mrb[1].mxu1 }
 0x198   :  { %v833_v45 = vld [vmem:[#allocation13 + $0x58] sm:$0xff]  ;;  %v925_v47 = vld [vmem:[#allocation14 + $0x50] sm:$0xff] }
 0x199   :  { %v624_v48 = vadd.f32 %v623_v46, %v622_v44  ;;  %v832_v44 = vld [vmem:[#allocation13 + $0x50] sm:$0xff] }
 0x19a   :  { %v1937_v46 = vpack.c.bf16 %v833_v45, %v832_v44 }
 0x1b6   :  { %v408_v49 = vpop.f32.mrb[2].mxu0  ;;  %v2630_v50 = vpop.f32.mrb[2].mxu1 }
 0x1b7   :  { %v625_v51 = vmul.f32 %v408_v49, %v408_v49  ;;  %v1101_v53 = vmul.f32 %v2630_v50, %v268_v42  ;;  %v1448_v54 = vpop.f32.mrb[3].mxu0  ;;  %v1483_v55 = vpop.f32.mrb[3].mxu1  ;;  %v924_v42 = vld [vmem:[#allocation14 + $0x48] sm:$0xff] }
 0x1b8   :  { %v927_v55 = vld [vmem:[#allocation14 + $0x60] sm:$0xff] }
 0x1b9   :  { %v626_v56 = vadd.f32 %v625_v51, %v624_v48  ;;  %v926_v48 = vld [vmem:[#allocation14 + $0x58] sm:$0xff]  ;;  %v834_v51 = vld [vmem:[#allocation13 + $0x60] sm:$0xff] }
 0x1bb   :  { %v627_v57 = vadd.f32 1e-08, %v626_v56  ;;  %v928_v56 = vld [vmem:[#allocation14 + $0x68] sm:$0xff] }
 0x1bd   :  { %2009 = vrsqrt.f32 %v627_v57  ;;  %vm630_vm1 = vcmp.eq.f32.partialorder %v627_v57, inf  ;;  %v633_v60 = vand.u32 2147483648, %v627_v57  ;;  %vm632_vm2 = vcmp.eq.f32.partialorder %v627_v57, 0.0 }
 0x1c7   :  { %v2010_v58 = vpop.eup %2009 }
 0x1c8   :  { %v629_v59 = vmul.f32 %v2010_v58, %v627_v57  ;;  %v836_v58 = vld [vmem:[#allocation13 + $0x70] sm:$0xff] }
 0x1ca   :  { %v631_v61 = vsel %vm630_vm1, %v627_v57, %v629_v59  ;;  %v1964_v57 = vpack.c.bf16 %v928_v56, %v927_v55  ;;  %v837_v59 = vld [vmem:[#allocation13 + $0x78] sm:$0xff] }
 0x1cb   :  { %v634_v62 = vsel %vm632_vm2, %v633_v60, %v631_v61  ;;  %v1943_v60 = vpack.c.bf16 %v837_v59, %v836_v58  ;;  %v929_v61 = vld [vmem:[#allocation14 + $0x70] sm:$0xff] }
 0x1cc   :  { %1587 = vmatmul.mubr.f32.vlgmr.msra.gmra.mrb[6].mxu0 %v634_v62  ;;  %v930_v62 = vld [vmem:[#allocation14 + $0x78] sm:$0xff] }
 0x1cd   :  { %1656 = vmatprep.mubr.msk.f32.mxu0 %vm2283_vm0, %v2284_v1  ;;  %1923 = vmatpush3.bf16.msra.mxu0 %v1922_v12 }
 0x1ce   :  { %1924 = vmatprep.subr.bf16.mxu0 %v2282_v0 }
 0x1d1   :  { %1926 = vmatpush3.bf16.msra.mxu0 %v1925_v19  ;;  %v1010_v19 = vld [vmem:[#allocation16 + $0x10] sm:$0xff] }
 0x1d2   :  { %1927 = vmatprep.subr.bf16.mxu0 %v2282_v0  ;;  %v1973_v21 = vpack.c.bf16 %v1011_v20, %v1010_v19 }
 0x1d5   :  { %1929 = vmatpush3.bf16.msra.mxu0 %v1928_v25  ;;  %v1015_v25 = vld [vmem:[#allocation16 + $0x38] sm:$0xff] }
 0x1d6   :  { %v2635_v63 = vpop.f32.mrb[4].mxu0  ;;  %v2637_v2 = vpop.f32.mrb[4].mxu1  ;;  %1930 = vmatprep.subr.bf16.mxu0 %v2282_v0  ;;  %v1979_v26 = vpack.c.bf16 %v1015_v25, %v1014_v24 }
 0x1d7   :  { %v1102_v3 = vmul.f32 %v2635_v63, %v338_v43  ;;  %v1104_v4 = vmul.f32 %v2637_v2, %v408_v49  ;;  %v1518_v5 = vpop.f32.mrb[5].mxu0  ;;  %v1553_v6 = vpop.f32.mrb[5].mxu1  ;;  %v1958_v43 = vpack.c.bf16 %v924_v42, %v923_v40  ;;  %v1961_v49 = vpack.c.bf16 %v926_v48, %v925_v47  ;;  %v1155_v40 = vld [vmem:[%s2725_s11] ss:$0 sm:$0xff]  ;;  %s2213_s11 = scalar_lea.vmem %s1136_s3, 384 }
 0x1d8   :  { %v1152_v5 = vld [vmem:[%s2720_s6] ss:$0 sm:$0xff]  ;;  %p2214_p2 = scmp.ne.s32.totalorder %s1136_s3, %s2213_s11  ;;  %p2219_p4 = scmp.lt.s32.totalorder %s2213_s11, %s2213_s11 }
 0x1d9   :  { %v1103_v7 = vadd.f32 %v1102_v3, %v1101_v53  ;;  %1932 = vmatpush3.bf16.msra.mxu0 %v1931_v33  ;;  %1959 = vmatpush3.bf16.msra.mxu1 %v1958_v43  ;;  %v835_v53 = vld [vmem:[#allocation13 + $0x68] sm:$0xff]  ;;  %v1967_v3 = vpack.c.bf16 %v930_v62, %v929_v61 }
 0x1da   :  { %1933 = vmatprep.subr.bf16.mxu0 %v2282_v0  ;;  %1960 = vmatprep.subr.bf16.mxu1 %v2282_v0  ;;  %v1940_v54 = vpack.c.bf16 %v835_v53, %v834_v51  ;;  %p2220_p5 = por %p2219_p4, %p2218_p3 }
 0x1db   :  { %v2641_v8 = vadd.f32 %v1104_v4, %v1103_v7 }
 0x1dc   :  { %p2221_p6 = pnand %p2220_p5, %p2214_p2 }
 0x1dd   :  { %1935 = vmatpush3.bf16.msra.mxu0 %v1934_v39  ;;  %1962 = vmatpush3.bf16.msra.mxu1 %v1961_v49  ;;  %v1991_v39 = vpack.c.bf16 %v1023_v38, %v1022_v37 }
 0x1de   :  { %1936 = vmatprep.subr.bf16.mxu0 %v2282_v0  ;;  %1963 = vmatprep.subr.bf16.mxu1 %v2282_v0 }
 0x1e1   :  { %1938 = vmatpush3.bf16.msra.mxu0 %v1937_v46  ;;  %1965 = vmatpush3.bf16.msra.mxu1 %v1964_v57 }
 0x1e2   :  { %1939 = vmatprep.subr.bf16.mxu0 %v2282_v0  ;;  %1966 = vmatprep.subr.bf16.mxu1 %v2282_v0 }
 0x1e5   :  { %1941 = vmatpush3.bf16.msra.mxu0 %v1940_v54  ;;  %1968 = vmatpush3.bf16.msra.mxu1 %v1967_v3 }
 0x1e6   :  { %1942 = vmatprep.subr.bf16.mxu0 %v2282_v0 }
 0x1e9   :  { %1944 = vmatpush3.bf16.msra.mxu0 %v1943_v60 }
 0x1ea   :  { %1969 = vmatprep.subr.bf16.mxu0 %v2282_v0 }
 0x1f7   :  { %v2643_v11 = vpop.f32.mrb[6].mxu1 }
 0x1f8   :  { %v1623_v15 = vpop.f32.mrb[7].mxu1 }
 0x1f9   :  { %v1009_v15 = vld [vmem:[#allocation16 + $0x8] sm:$0xff] }
 0x1fa   :  { %v1970_v17 = vpack.c.bf16 %v1009_v15, %v1008_v14 }
 0x29f   :  { %v733_v4 = vpop.f32.mrb[6].mxu0 }
 0x2a0   :  { %v804_v6 = vadd.f32 %v2643_v11, %v733_v4  ;;  %v1588_v7 = vpop.f32.mrb[7].mxu0  ;;  %v1012_v11 = vld [vmem:[#allocation16 + $0x20] sm:$0xff] }
 0x2a1   :  { %v1976_v23 = vpack.c.bf16 %v1013_v22, %v1012_v11 }
 0x2a2   :  { %v814_v9 = vadd.f32 %v1152_v5, %v804_v6 }
 0x2a4   :  { %v1153_v10 = vmul.f32 -1.442695, %v814_v9 }
 0x2a6   :  { %2011 = vpow2.f32 %v1153_v10 }
 0x2b0   :  { %v2012_v12 = vpop.eup %2011 }
 0x2b1   :  { %v818_v13 = vadd.f32 1.0, %v2012_v12 }
 0x2b3   :  { %2013 = vrcp.f32 %v818_v13 }
 0x2bd   :  { %v2014_v16 = vpop.eup %2013 }
 0x2be   :  { %v821_v18 = vmul.f32 %v2014_v16, %v814_v9 }
 0x2c0   :  { %1657 = vmatmul.mubr.f32.vlgmr.msra.gmra.mrb[8].mxu0 %v821_v18  ;;  %1692 = vmatmul.mubr.f32.vlgmr.msra.gmra.mrb[8].mxu1 %v821_v18 }
 0x2c1   :  { %1971 = vmatpush3.bf16.msra.mxu0 %v1970_v17  ;;  %1726 = vmatprep.mubr.msk.f32.mxu0 %vm2283_vm0, %v2284_v1  ;;  %v1018_v1 = vld [vmem:[#allocation16 + $0x50] sm:$0xff] }
 0x2c2   :  { %1972 = vmatprep.subr.bf16.mxu0 %v2282_v0  ;;  %v1985_v33 = vpack.c.bf16 %v1019_v32, %v1018_v1 }
 0x2c5   :  { %1974 = vmatpush3.bf16.msra.mxu0 %v1973_v21 }
 0x2c6   :  { %1975 = vmatprep.subr.bf16.mxu0 %v2282_v0 }
 0x2c9   :  { %1977 = vmatpush3.bf16.msra.mxu0 %v1976_v23 }
 0x2ca   :  { %1978 = vmatprep.subr.bf16.mxu0 %v2282_v0 }
 0x2cd   :  { %1980 = vmatpush3.bf16.msra.mxu0 %v1979_v26 }
 0x2ce   :  { %1981 = vmatprep.subr.bf16.mxu0 %v2282_v0 }
 0x2d1   :  { %1983 = vmatpush3.bf16.msra.mxu0 %v1982_v31 }
 0x2d2   :  { %1984 = vmatprep.subr.bf16.mxu0 %v2282_v0 }
 0x2d5   :  { %1986 = vmatpush3.bf16.msra.mxu0 %v1985_v33 }
 0x2d6   :  { %1987 = vmatprep.subr.bf16.mxu0 %v2282_v0 }
 0x2d9   :  { %1989 = vmatpush3.bf16.msra.mxu0 %v1988_v36 }
 0x2da   :  { %1990 = vmatprep.subr.bf16.mxu0 %v2282_v0 }
 0x2dd   :  { %1992 = vmatpush3.bf16.msra.mxu0 %v1991_v39 }
 0x2e0   :  { %1727 = vmatmul.mubr.f32.vlgmr.msra.gmra.mrb[10].mxu0 %v821_v18 }
 0x393   :  { %v911_v42 = vpop.f32.mrb[8].mxu0  ;;  %v1004_v43 = vpop.f32.mrb[8].mxu1 }
 0x394   :  { %v1005_v44 = vadd.f32 %v1155_v40, %v1004_v43  ;;  %v1658_v45 = vpop.f32.mrb[9].mxu0  ;;  %v1693_v46 = vpop.f32.mrb[9].mxu1 }
 0x396   :  { %v1110_v47 = vmul.f32 %v1005_v44, %v2630_v50  ;;  %v1112_v48 = vmul.f32 %v1005_v44, %v2635_v63  ;;  %v1114_v49 = vmul.f32 %v1005_v44, %v2637_v2 }
 0x398   :  { %v1111_v0 = vadd.f32 %v1110_v47, %v2539_v28  ;;  %v1113_v51 = vadd.f32 %v1112_v48, %v2541_v29  ;;  %v1115_v53 = vadd.f32 %v1114_v49, %v2575_v52 }
 0x39a   :  { %1116 = vst [vmem:[#allocation18] sm:$0xff] %v1111_v0  ;;  %1117 = vst [vmem:[#allocation18 + $0x8] sm:$0xff] %v1113_v51 }
 0x39b   :  { %1118 = vst [vmem:[#allocation18 + $0x10] sm:$0xff] %v1115_v53 }
 0x39c   :  { %2224 = shalt.err (!%p2221_p6)
}
 0x39d   :  { %s2225_s0 = scalar_lea.hbm %s2728_s14, 384 }
 0x39e   :  { %p2226_p7 = scmp.ne.s32.totalorder %s2728_s14, %s2225_s0  ;;  %p2229_p8 = scmp.lt.u32.totalorder %s2225_s0, %s2728_s14 }
 0x3a0   :  { %p2231_p9 = pnand %p2229_p8, %p2226_p7 }
 0x3a2   :  { %2234 = shalt.err (!%p2231_p9)
}
 0x3a3   :  { %1138 = dma.vmem_to_hbm [thread:$0]  %s1136_s3, 384, %s2728_s14, [#allocation19]   ;;  %v1154_v28 = vld [vmem:[%s2724_s10] ss:$0 sm:$0xff] }
 0x3a4   :  { %v1156_v29 = vld [vmem:[%s2726_s12] ss:$0 sm:$0xff]  ;;  %v912_v52 = vadd.f32 %v1154_v28, %v911_v42  ;;  %s2286_s15 = smov [#allocation17]  }
 0x3a5   :  { %s1125_s5 = sshll.u32 %s2286_s15, 4  ;;  %s1126_s5 = int_to_ptr.vmem [resolvable:$true] %s1125_s5 }
 0x3a6   :  { %v1106_v54 = vadd.f32 %v912_v52, %v2623_v41  ;;  %s2235_s14 = scalar_lea.vmem %s1126_s5, 128  ;;  %p2240_p11 = scmp.lt.s32.totalorder %s1126_s5, %s1126_s5 }
 0x3a7   :  { %p2236_p10 = scmp.ne.s32.totalorder %s1126_s5, %s2235_s14  ;;  %p2241_p12 = scmp.lt.s32.totalorder %s2235_s14, %s2235_s14 }
 0x3a9   :  { %p2242_p13 = por %p2241_p12, %p2240_p11 }
 0x3ab   :  { %p2243_p0 = pnand %p2242_p13, %p2236_p10 }
 0x3b3   :  { %v1097_v50 = vpop.f32.mrb[10].mxu0 }
 0x3b4   :  { %v1098_v63 = vadd.f32 %v1156_v29, %v1097_v50  ;;  %v1728_v2 = vpop.f32.mrb[11].mxu0 }
 0x3b6   :  { %v1107_v55 = vmul.f32 %v2641_v8, %v1098_v63 }
 0x3b8   :  { %v1108_v56 = vadd.f32 %v1107_v55, %v1106_v54 }
 0x3ba   :  { %1109 = vst [vmem:[#allocation17] sm:$0xff] %v1108_v56 }
 0x3bb   :  { %2246 = shalt.err (!%p2243_p0)
}
 0x3bc   :  { %s2247_s2 = scalar_lea.hbm %s2727_s13, 128 }
 0x3bd   :  { %p2248_p1 = scmp.ne.s32.totalorder %s2727_s13, %s2247_s2  ;;  %p2251_p2 = scmp.lt.u32.totalorder %s2247_s2, %s2727_s13 }
 0x3bf   :  { %p2253_p3 = pnand %p2251_p2, %p2248_p1 }
 0x3c1   :  { %2256 = shalt.err (!%p2253_p3)
}
 0x3c2   :  { %1128 = dma.vmem_to_hbm [thread:$0]  %s1126_s5, 128, %s2727_s13, [#allocation4]  }
 0x3c3   :  { %2267 = dma.done.wait [#allocation4], 128  }
 0x3c4   :  { %2268 = vsyncadd [#allocation4], 4294967168 }
 0x3c5   :  { %2269 = dma.done.wait [#allocation19], 384  }
 0x3c6   :  { %2270 = vsyncadd [#allocation19], 4294966912 }
 0x3c7   :  { %1145 = vsyncpa [#allocation3], 1 }
 0x3c8   :  { %1146 = vsyncpa [#allocation6], 1 }
 0x3c9   :  { %1147 = vsyncpa [#allocation9], 1 }
 0x3ca   :  { %1148 = vsyncpa [#allocation12], 1 }
 0x3cb   :  { %1149 = vsyncpa [#allocation15], 1 }
 0x3cc   :  { %1150 = vsyncpa [#allocation4], 1 }
 0x3cd   :  { %1151 = vsyncpa [#allocation19], 1 }

</bundles_post_ra>
